<compile_context>
chip_gen: v7x
topology: tpu7x:2x2x1
jax: 0.10.0
libtpu: 0.0.40
codegen_flags: <defaults>
</compile_context>

<pallas_src>
import math

import jax
import jax.numpy as jnp
from jax.experimental import pallas as pl
from jax.experimental.pallas import tpu as pltpu


# ---------------------------------------------------------------------------
# Kernels
# ---------------------------------------------------------------------------
def _mdrnn_cell_kernel(ih_ref, iv_ref, hh_ref, hv_ref,
                       wT_in_ref, wT_hid_ref, b2_ref, o_ref):
    """Both hidden states present.

    out = tanh( (ih+iv) @ W_in.T + (hh+hv) @ W_hid.T + 2*b )
    Sums are formed in the input dtype (f32) and only then cast to the weight
    compute dtype (bf16 by default) for the MXU; accumulation + epilogue in f32.
    """
    x_sum = (ih_ref[...] + iv_ref[...]).astype(wT_in_ref.dtype)
    h_sum = (hh_ref[...] + hv_ref[...]).astype(wT_hid_ref.dtype)
    acc = jnp.dot(x_sum, wT_in_ref[...], preferred_element_type=jnp.float32)
    acc = acc + jnp.dot(h_sum, wT_hid_ref[...],
                        preferred_element_type=jnp.float32)
    acc = acc + b2_ref[...].astype(jnp.float32)     # bias pre-doubled outside
    o_ref[...] = jnp.tanh(acc).astype(o_ref.dtype)


def _mdrnn_cell_kernel_onehx(ih_ref, iv_ref, h_ref,
                             wT_in_ref, wT_hid_ref, b2_ref, o_ref):
    """Exactly one hidden state present (the other is implicitly zero)."""
    x_sum = (ih_ref[...] + iv_ref[...]).astype(wT_in_ref.dtype)
    h = h_ref[...].astype(wT_hid_ref.dtype)
    acc = jnp.dot(x_sum, wT_in_ref[...], preferred_element_type=jnp.float32)
    acc = acc + jnp.dot(h, wT_hid_ref[...], preferred_element_type=jnp.float32)
    acc = acc + b2_ref[...].astype(jnp.float32)
    o_ref[...] = jnp.tanh(acc).astype(o_ref.dtype)


def _mdrnn_cell_kernel_nohx(ih_ref, iv_ref, wT_in_ref, b2_ref, o_ref):
    """Fast path: hx_h = hx_v = 0 -> the hidden half contributes nothing."""
    x_sum = (ih_ref[...] + iv_ref[...]).astype(wT_in_ref.dtype)
    acc = jnp.dot(x_sum, wT_in_ref[...], preferred_element_type=jnp.float32)
    acc = acc + b2_ref[...].astype(jnp.float32)
    o_ref[...] = jnp.tanh(acc).astype(o_ref.dtype)


# ---------------------------------------------------------------------------
# Parameter prep (call ONCE, outside any recurrence)
# ---------------------------------------------------------------------------
def prepare_mdrnn_params(weight, bias, input_size, compute_dtype=jnp.bfloat16):
    """Split + transpose the PyTorch-layout weight, pad lane-dense, double bias.

    weight : (hidden_size, input_size + hidden_size)   (nn.Linear layout)
    bias   : (hidden_size,)
    Returns (wT_in, wT_hid, b2) with shapes (Hp = hidden_size padded to 128):
      wT_in  : (input_size,  Hp)   compute_dtype
      wT_hid : (hidden_size, Hp)   compute_dtype
      b2     : (1, Hp)             float32  == 2 * bias (linear1 applied twice)
    """
    hidden_size = weight.shape[0]
    hp = ((hidden_size + 127) // 128) * 128      # lane-dense output dim
    pad = hp - hidden_size
    wT_in = jnp.pad(jnp.transpose(weight[:, :input_size]), ((0, 0), (0, pad)))
    wT_hid = jnp.pad(jnp.transpose(weight[:, input_size:]), ((0, 0), (0, pad)))
    b2 = jnp.pad(bias + bias, (0, pad)).reshape(1, hp).astype(jnp.float32)
    return wT_in.astype(compute_dtype), wT_hid.astype(compute_dtype), b2


# ---------------------------------------------------------------------------
# Forward wrapper
# ---------------------------------------------------------------------------
def _pick_batch_tile(batch):
    """Largest convenient batch tile that divides the batch (whole batch if small)."""
    if batch <= 256:
        return batch
    for tb in (256, 128, 64, 32, 16, 8):
        if batch % tb == 0:
            return tb
    return batch


def mdrnn_cell_forward(input_h, input_v, wT_in, wT_hid, b2,
                       hx_h=None, hx_v=None):
    """JAX wrapper mirroring MDRNNCell.forward (params from prepare_mdrnn_params).

    input_h, input_v : (B, input_size)
    wT_in, wT_hid, b2: from prepare_mdrnn_params()
    hx_h, hx_v       : (B, hidden_size) or None (-> treated as zeros, fast path)
    """
    batch, input_size = input_h.shape
    hidden = wT_hid.shape[0]
    hp = wT_in.shape[1]
    dtype = input_h.dtype

    tb = _pick_batch_tile(batch)
    grid = (batch // tb,)

    # Block shapes (batch-tiled activations, VMEM-resident weights/bias).
    x_blk, h_blk = (tb, input_size), (tb, hidden)
    win_blk, whd_blk, b_blk, out_blk = (input_size, hp), (hidden, hp), (1, hp), (tb, hp)

    x_spec = pl.BlockSpec(x_blk, lambda i: (i, 0))
    h_spec = pl.BlockSpec(h_blk, lambda i: (i, 0))
    win_spec = pl.BlockSpec(win_blk, lambda i: (0, 0))    # constant -> VMEM-resident
    whd_spec = pl.BlockSpec(whd_blk, lambda i: (0, 0))
    b_spec = pl.BlockSpec(b_blk, lambda i: (0, 0))
    out_spec = pl.BlockSpec(out_blk, lambda i: (i, 0))

    if hx_h is None and hx_v is None:
        kernel = _mdrnn_cell_kernel_nohx
        operands = (input_h, input_v, wT_in, b2)
        in_specs = [x_spec, x_spec, win_spec, b_spec]
        blk_shapes = [x_blk, x_blk, win_blk, b_blk]
        k_dim = input_size
    elif hx_h is not None and hx_v is not None:
        kernel = _mdrnn_cell_kernel
        operands = (input_h, input_v, hx_h, hx_v, wT_in, wT_hid, b2)
        in_specs = [x_spec, x_spec, h_spec, h_spec, win_spec, whd_spec, b_spec]
        blk_shapes = [x_blk, x_blk, h_blk, h_blk, win_blk, whd_blk, b_blk]
        k_dim = input_size + hidden
    else:
        h_only = hx_h if hx_h is not None else hx_v
        kernel = _mdrnn_cell_kernel_onehx
        operands = (input_h, input_v, h_only, wT_in, wT_hid, b2)
        in_specs = [x_spec, x_spec, h_spec, win_spec, whd_spec, b_spec]
        blk_shapes = [x_blk, x_blk, h_blk, win_blk, whd_blk, b_blk]
        k_dim = input_size + hidden

    out_shape = jax.ShapeDtypeStruct((batch, hp), dtype)

    # Advisory cost estimate so XLA can overlap this small call with neighbors.
    out_bytes = batch * hp * jnp.dtype(dtype).itemsize
    bytes_accessed = int(sum(int(x.size) * x.dtype.itemsize for x in operands)
                         + out_bytes)
    cost = pl.CostEstimate(flops=int(2 * batch * k_dim * hp),
                           transcendentals=int(batch * hp),
                           bytes_accessed=bytes_accessed)

    # VMEM budget: double-buffered blocks + resident weights/bias + margin.
    blk_bytes = sum(math.prod(s) * a.dtype.itemsize
                    for s, a in zip(blk_shapes, operands))
    blk_bytes += math.prod(out_blk) * jnp.dtype(dtype).itemsize
    vmem_need = 2 * blk_bytes + (1 << 20)
    cp_kwargs = dict(dimension_semantics=("parallel",))
    if vmem_need > (16 << 20):     # raise only when the v5e default could bite
        cp_kwargs["vmem_limit_bytes"] = int(vmem_need)

    out = pl.pallas_call(
        kernel,
        grid=grid,
        in_specs=in_specs,
        out_specs=out_spec,
        out_shape=out_shape,
        compiler_params=pltpu.CompilerParams(**cp_kwargs),
        cost_estimate=cost,
    )(*operands)

    return out if hp == hidden else out[:, :hidden]


# ---------------------------------------------------------------------------
# Self-test
# ---------------------------------------------------------------------------
if __name__ == "__main__":
    # Small deterministic setup consistent with the module's forward:
    # batch=8, input_size=16, hidden_size=32.
    B, input_size, hidden_size = 8, 16, 32
    F = input_size + hidden_size

    key = jax.random.PRNGKey(0)
    k_ih, k_iv, k_w, k_b, k_hh, k_hv, k_big = jax.random.split(key, 7)

    # PyTorch-style uniform(-1/sqrt(fan_in), 1/sqrt(fan_in)) init.
    bound = 1.0 / jnp.sqrt(jnp.float32(F))
    weight = jax.random.uniform(k_w, (hidden_size, F), jnp.float32, -bound, bound)
    bias = jax.random.uniform(k_b, (hidden_size,), jnp.float32, -bound, bound)

    input_h = jax.random.normal(k_ih, (B, input_size), jnp.float32)
    input_v = jax.random.normal(k_iv, (B, input_size), jnp.float32)
    hx_h = jax.random.normal(k_hh, (B, hidden_size), jnp.float32)
    hx_v = jax.random.normal(k_hv, (B, hidden_size), jnp.float32)

    # Pure-JAX reference mirroring the PyTorch forward exactly.
    def ref(ih, iv, hh, hv):
        lin = lambda x: x @ weight.T + bias
        return jnp.tanh(lin(jnp.concatenate((ih, hh), 1)) +
                        lin(jnp.concatenate((iv, hv), 1)))

    zeros_h = jnp.zeros((B, hidden_size), jnp.float32)

    # --- f32 compute path: must match the reference tightly. -----------------
    p32 = prepare_mdrnn_params(weight, bias, input_size, compute_dtype=jnp.float32)
    out32 = mdrnn_cell_forward(input_h, input_v, *p32, hx_h=hx_h, hx_v=hx_v)
    assert jnp.allclose(out32, ref(input_h, input_v, hx_h, hx_v),
                        atol=1e-5, rtol=1e-5)

    # --- bf16 compute path (default): relaxed tolerance. ---------------------
    pbf = prepare_mdrnn_params(weight, bias, input_size)     # bf16 weights
    out_bf = mdrnn_cell_forward(input_h, input_v, *pbf, hx_h=hx_h, hx_v=hx_v)
    out_nohx = mdrnn_cell_forward(input_h, input_v, *pbf)                 # hx None
    out_onehx = mdrnn_cell_forward(input_h, input_v, *pbf, hx_h=hx_h)     # hx_v None
    assert jnp.allclose(out_bf, ref(input_h, input_v, hx_h, hx_v),
                        atol=5e-2, rtol=0)
    assert jnp.allclose(out_nohx, ref(input_h, input_v, zeros_h, zeros_h),
                        atol=5e-2, rtol=0)
    assert jnp.allclose(out_onehx, ref(input_h, input_v, hx_h, zeros_h),
                        atol=5e-2, rtol=0)

    # --- Larger batch: exercises the tiled (grid > 1, "parallel") path. ------
    Bb = 512
    kb1, kb2, kb3, kb4 = jax.random.split(k_big, 4)
    ih_b = jax.random.normal(kb1, (Bb, input_size), jnp.float32)
    iv_b = jax.random.normal(kb2, (Bb, input_size), jnp.float32)
    hh_b = jax.random.normal(kb3, (Bb, hidden_size), jnp.float32)
    hv_b = jax.random.normal(kb4, (Bb, hidden_size), jnp.float32)
    out_big = mdrnn_cell_forward(ih_b, iv_b, *pbf, hx_h=hh_b, hx_v=hv_b)
    assert jnp.allclose(out_big, ref(ih_b, iv_b, hh_b, hv_b), atol=5e-2, rtol=0)

    jax.block_until_ready((out32, out_bf, out_nohx, out_onehx, out_big))
    print("KERNEL_OK")
</pallas_src>

<mosaic_0001>
module attributes {stable_mosaic.version = 11 : i64} {
  func.func @_mdrnn_cell_kernel(%arg0: i32, %arg1: memref<8x16xf32, #tpu.memory_space<vmem>>, %arg2: memref<8x16xf32, #tpu.memory_space<vmem>>, %arg3: memref<8x32xf32, #tpu.memory_space<vmem>>, %arg4: memref<8x32xf32, #tpu.memory_space<vmem>>, %arg5: memref<16x128xf32, #tpu.memory_space<vmem>>, %arg6: memref<32x128xf32, #tpu.memory_space<vmem>>, %arg7: memref<1x128xf32, #tpu.memory_space<vmem>>, %arg8: memref<8x128xf32, #tpu.memory_space<vmem>>) attributes {dimension_semantics = [#tpu.dimension_semantics<parallel>], iteration_bounds = array<i64: 1>, scalar_prefetch = 0 : i64, scratch_operands = 0 : i64, tpu.core_type = #tpu.core_type<tc>, window_params = [{transform_indices = @transform_0, window_bounds = array<i64: 8, 16>}, {transform_indices = @transform_1, window_bounds = array<i64: 8, 16>}, {transform_indices = @transform_2, window_bounds = array<i64: 8, 32>}, {transform_indices = @transform_3, window_bounds = array<i64: 8, 32>}, {pipeline_mode = #tpu.pipeline_mode<synchronous>, transform_indices = @transform_4, window_bounds = array<i64: 16, 128>}, {pipeline_mode = #tpu.pipeline_mode<synchronous>, transform_indices = @transform_5, window_bounds = array<i64: 32, 128>}, {pipeline_mode = #tpu.pipeline_mode<synchronous>, transform_indices = @transform_6, window_bounds = array<i64: 1, 128>}, {transform_indices = @transform_7, window_bounds = array<i64: 8, 128>}]} {
    %c0 = arith.constant 0 : index
    %c0_0 = arith.constant 0 : index
    %0 = vector.load %arg1[%c0, %c0_0] : memref<8x16xf32, #tpu.memory_space<vmem>>, vector<8x16xf32>
    %c0_1 = arith.constant 0 : index
    %c0_2 = arith.constant 0 : index
    %1 = vector.load %arg2[%c0_1, %c0_2] : memref<8x16xf32, #tpu.memory_space<vmem>>, vector<8x16xf32>
    %2 = arith.addf %0, %1 : vector<8x16xf32>
    %c0_3 = arith.constant 0 : index
    %c0_4 = arith.constant 0 : index
    %3 = vector.load %arg3[%c0_3, %c0_4] : memref<8x32xf32, #tpu.memory_space<vmem>>, vector<8x32xf32>
    %c0_5 = arith.constant 0 : index
    %c0_6 = arith.constant 0 : index
    %4 = vector.load %arg4[%c0_5, %c0_6] : memref<8x32xf32, #tpu.memory_space<vmem>>, vector<8x32xf32>
    %5 = arith.addf %3, %4 : vector<8x32xf32>
    %c0_7 = arith.constant 0 : index
    %c0_8 = arith.constant 0 : index
    %6 = vector.load %arg5[%c0_7, %c0_8] : memref<16x128xf32, #tpu.memory_space<vmem>>, vector<16x128xf32>
    %cst = arith.constant dense<0.000000e+00> : vector<8x128xf32>
    %7 = tpu.matmul %2, %6, %cst {dimension_numbers = #tpu.dot_dimension_numbers<[1], [0], [0], [1], [0, 0, 1, 1], [], []>} : vector<8x16xf32>, vector<16x128xf32>, vector<8x128xf32> -> vector<8x128xf32>
    %c0_9 = arith.constant 0 : index
    %c0_10 = arith.constant 0 : index
    %8 = vector.load %arg6[%c0_9, %c0_10] : memref<32x128xf32, #tpu.memory_space<vmem>>, vector<32x128xf32>
    %cst_11 = arith.constant dense<0.000000e+00> : vector<8x128xf32>
    %9 = tpu.matmul %5, %8, %cst_11 {dimension_numbers = #tpu.dot_dimension_numbers<[1], [0], [0], [1], [0, 0, 1, 1], [], []>} : vector<8x32xf32>, vector<32x128xf32>, vector<8x128xf32> -> vector<8x128xf32>
    %10 = arith.addf %7, %9 : vector<8x128xf32>
    %c0_12 = arith.constant 0 : index
    %c0_13 = arith.constant 0 : index
    %11 = vector.load %arg7[%c0_12, %c0_13] : memref<1x128xf32, #tpu.memory_space<vmem>>, vector<1x128xf32>
    %12 = vector.broadcast %11 : vector<1x128xf32> to vector<8x128xf32>
    %13 = arith.addf %10, %12 : vector<8x128xf32>
    %14 = math.tanh %13 : vector<8x128xf32>
    %c0_14 = arith.constant 0 : index
    %c0_15 = arith.constant 0 : index
    %15 = vector.load %arg8[%c0_14, %c0_15] : memref<8x128xf32, #tpu.memory_space<vmem>>, vector<8x128xf32>
    tpu.vector_store %arg8[%c0_14, %c0_15], %14 {strides = array<i32>} : memref<8x128xf32, #tpu.memory_space<vmem>>, vector<8x128xf32>,
    return
  }
  func.func @transform_0(%arg0: i32) -> (i32, i32) {
    %c0_i32 = arith.constant 0 : i32
    %c0_i32_0 = arith.constant 0 : i32
    return %arg0, %c0_i32 : i32, i32
  }
  func.func @transform_1(%arg0: i32) -> (i32, i32) {
    %c0_i32 = arith.constant 0 : i32
    %c0_i32_0 = arith.constant 0 : i32
    return %arg0, %c0_i32 : i32, i32
  }
  func.func @transform_2(%arg0: i32) -> (i32, i32) {
    %c0_i32 = arith.constant 0 : i32
    %c0_i32_0 = arith.constant 0 : i32
    return %arg0, %c0_i32 : i32, i32
  }
  func.func @transform_3(%arg0: i32) -> (i32, i32) {
    %c0_i32 = arith.constant 0 : i32
    %c0_i32_0 = arith.constant 0 : i32
    return %arg0, %c0_i32 : i32, i32
  }
  func.func @transform_4(%arg0: i32) -> (i32, i32) {
    %c0_i32 = arith.constant 0 : i32
    %c0_i32_0 = arith.constant 0 : i32
    %c0_i32_1 = arith.constant 0 : i32
    return %c0_i32, %c0_i32_0 : i32, i32
  }
  func.func @transform_5(%arg0: i32) -> (i32, i32) {
    %c0_i32 = arith.constant 0 : i32
    %c0_i32_0 = arith.constant 0 : i32
    %c0_i32_1 = arith.constant 0 : i32
    return %c0_i32, %c0_i32_0 : i32, i32
  }
  func.func @transform_6(%arg0: i32) -> (i32, i32) {
    %c0_i32 = arith.constant 0 : i32
    %c0_i32_0 = arith.constant 0 : i32
    %c0_i32_1 = arith.constant 0 : i32
    return %c0_i32, %c0_i32_0 : i32, i32
  }
  func.func @transform_7(%arg0: i32) -> (i32, i32) {
    %c0_i32 = arith.constant 0 : i32
    %c0_i32_0 = arith.constant 0 : i32
    return %arg0, %c0_i32 : i32, i32
  }
}

</mosaic_0001>

<bundles_post_ra>
// kernel: tpu_custom_call.1
= control target key start
LH: loop header
LB: loop body
LE: loop exit
PB: predicated region body
PF: predicated region fallthrough
CT: control target
= control target key end

     0   :  { %12 = vsyncpa [#allocation3], 0  ;;  %s609_s0 = inlined_call_operand.hbm [shape: f32[8,16], index: 0, kind: input, shape index: {}]   ;;  %s610_s1 = inlined_call_operand.hbm [shape: f32[8,16], index: 1, kind: input, shape index: {}]   ;;  %s611_s2 = inlined_call_operand.hbm [shape: f32[8,32], index: 2, kind: input, shape index: {}]   ;;  %s612_s3 = inlined_call_operand.vmem [shape: f32[8,32], index: 3, kind: input, shape index: {}]   ;;  %s613_s4 = inlined_call_operand.hbm [shape: f32[16,128], index: 4, kind: input, shape index: {}]   ;;  %s614_s5 = inlined_call_operand.hbm [shape: f32[32,128], index: 5, kind: input, shape index: {}]   ;;  %s615_s6 = inlined_call_operand.vmem [shape: f32[1,128], index: 6, kind: input, shape index: {}]   ;;  %s616_s7 = inlined_call_operand.hbm [shape: f32[8,128], index: 7, kind: output, shape index: {}]  }
   0x1   :  { %13 = vsyncpa [#allocation6], 0 }
   0x2   :  { %14 = vsyncpa [#allocation9], 0 }
   0x3   :  { %15 = vsyncpa [#allocation4], 0  ;;  %s467_s24 = smov [#allocation5]   ;;  %s468_s26 = smov [#allocation8]  }
   0x4   :  { %s32_s25 = sshll.u32 %s467_s24, 4  ;;  %s53_s27 = sshll.u32 %s468_s26, 4  ;;  %s33_s25 = int_to_ptr.vmem [resolvable:$true] %s32_s25  ;;  %s518_s27 = int_to_ptr.vmem [resolvable:$true] %s53_s27 }
   0x5   :  { %s327_s30 = scalar_lea.hbm %s610_s1, 128 }
   0x6   :  { %p328_p0 = scmp.ne.s32.totalorder %s610_s1, %s327_s30  ;;  %p331_p1 = scmp.lt.u32.totalorder %s327_s30, %s610_s1 }
   0x8   :  { %p333_p2 = pnand %p331_p1, %p328_p0 }
   0xa   :  { %336 = shalt.err (!%p333_p2)
}
   0xb   :  { %s337_s12 = scalar_lea.vmem %s33_s25, 128  ;;  %p342_p4 = scmp.lt.s32.totalorder %s33_s25, %s33_s25 }
   0xc   :  { %p338_p3 = scmp.ne.s32.totalorder %s33_s25, %s337_s12  ;;  %p343_p5 = scmp.lt.s32.totalorder %s337_s12, %s337_s12 }
   0xe   :  { %p344_p6 = por %p343_p5, %p342_p4 }
  0x10   :  { %p345_p7 = pnand %p344_p6, %p338_p3 }
  0x12   :  { %348 = shalt.err (!%p345_p7)
}
  0x13   :  { %35 = dma.hbm_to_vmem [thread:$0]  %s610_s1, 128, %s33_s25, [#allocation6]  }
  0x14   :  { %s349_s17 = scalar_lea.hbm %s613_s4, 256 }
  0x15   :  { %p350_p8 = scmp.ne.s32.totalorder %s613_s4, %s349_s17  ;;  %p353_p9 = scmp.lt.u32.totalorder %s349_s17, %s613_s4 }
  0x17   :  { %p355_p10 = pnand %p353_p9, %p350_p8 }
  0x19   :  { %358 = shalt.err (!%p355_p10)
}
  0x1a   :  { %s359_s22 = scalar_lea.vmem %s518_s27, 256  ;;  %p364_p12 = scmp.lt.s32.totalorder %s518_s27, %s518_s27 }
  0x1b   :  { %p360_p11 = scmp.ne.s32.totalorder %s518_s27, %s359_s22  ;;  %p365_p13 = scmp.lt.s32.totalorder %s359_s22, %s359_s22 }
  0x1d   :  { %p366_p0 = por %p365_p13, %p364_p12 }
  0x1f   :  { %p367_p1 = pnand %p366_p0, %p360_p11 }
  0x21   :  { %370 = shalt.err (!%p367_p1)
}
  0x22   :  { %s469_s1 = smov 128   ;;  %s470_s23 = smov 8  }
  0x23   :  { %59 = dma.hbm_to_vmem [thread:$0]  %s613_s4, 256, %s518_s27, [#allocation9], %s469_s1, %s469_s1, %s470_s23  }
  0x24   :  { %s471_s26 = smov [#allocation2]   ;;  %s472_s29 = smov [#allocation7]  }
  0x25   :  { %s22_s28 = sshll.u32 %s471_s26, 4  ;;  %s42_s30 = sshll.u32 %s472_s29, 4  ;;  %s23_s28 = int_to_ptr.vmem [resolvable:$true] %s22_s28  ;;  %s43_s30 = int_to_ptr.vmem [resolvable:$true] %s42_s30 }
  0x26   :  { %s371_s10 = scalar_lea.hbm %s609_s0, 128 }
  0x27   :  { %p372_p2 = scmp.ne.s32.totalorder %s609_s0, %s371_s10  ;;  %p375_p3 = scmp.lt.u32.totalorder %s371_s10, %s609_s0 }
  0x29   :  { %p377_p4 = pnand %p375_p3, %p372_p2 }
  0x2b   :  { %380 = shalt.err (!%p377_p4)
}
  0x2c   :  { %s381_s4 = scalar_lea.vmem %s23_s28, 128  ;;  %p386_p6 = scmp.lt.s32.totalorder %s23_s28, %s23_s28 }
  0x2d   :  { %p382_p5 = scmp.ne.s32.totalorder %s23_s28, %s381_s4  ;;  %p387_p7 = scmp.lt.s32.totalorder %s381_s4, %s381_s4 }
  0x2f   :  { %p388_p8 = por %p387_p7, %p386_p6 }
  0x31   :  { %p389_p9 = pnand %p388_p8, %p382_p5 }
  0x33   :  { %392 = shalt.err (!%p389_p9)
}
  0x34   :  { %25 = dma.hbm_to_vmem [thread:$0]  %s609_s0, 128, %s23_s28, [#allocation3]  }
  0x35   :  { %s393_s18 = scalar_lea.hbm %s611_s2, 128 }
  0x36   :  { %p394_p10 = scmp.ne.s32.totalorder %s611_s2, %s393_s18  ;;  %p397_p11 = scmp.lt.u32.totalorder %s393_s18, %s611_s2 }
  0x38   :  { %p399_p12 = pnand %p397_p11, %p394_p10 }
  0x3a   :  { %402 = shalt.err (!%p399_p12)
}
  0x3b   :  { %s403_s24 = scalar_lea.vmem %s43_s30, 128  ;;  %p408_p0 = scmp.lt.s32.totalorder %s43_s30, %s43_s30 }
  0x3c   :  { %p404_p13 = scmp.ne.s32.totalorder %s43_s30, %s403_s24  ;;  %p409_p1 = scmp.lt.s32.totalorder %s403_s24, %s403_s24 }
  0x3e   :  { %p410_p2 = por %p409_p1, %p408_p0 }
  0x40   :  { %p411_p3 = pnand %p410_p2, %p404_p13 }
  0x42   :  { %414 = shalt.err (!%p411_p3)
}
  0x43   :  { %45 = dma.hbm_to_vmem [thread:$0]  %s611_s2, 128, %s43_s30, [#allocation6]  }
  0x44   :  { %s473_s26 = smov [#allocation10]   ;;  %s415_s9 = scalar_lea.hbm %s614_s5, 512 }
  0x45   :  { %s65_s28 = sshll.u32 %s473_s26, 4  ;;  %p416_p4 = scmp.ne.s32.totalorder %s614_s5, %s415_s9  ;;  %s66_s28 = int_to_ptr.vmem [resolvable:$true] %s65_s28 }
  0x46   :  { %p419_p5 = scmp.lt.u32.totalorder %s415_s9, %s614_s5 }
  0x48   :  { %p421_p6 = pnand %p419_p5, %p416_p4 }
  0x4a   :  { %424 = shalt.err (!%p421_p6)
}
  0x4b   :  { %s425_s14 = scalar_lea.vmem %s66_s28, 512  ;;  %p430_p8 = scmp.lt.s32.totalorder %s66_s28, %s66_s28 }
  0x4c   :  { %p426_p7 = scmp.ne.s32.totalorder %s66_s28, %s425_s14  ;;  %p431_p9 = scmp.lt.s32.totalorder %s425_s14, %s425_s14 }
  0x4e   :  { %p432_p10 = por %p431_p9, %p430_p8 }
  0x50   :  { %p433_p11 = pnand %p432_p10, %p426_p7 }
  0x52   :  { %436 = shalt.err (!%p433_p11)
}
  0x53   :  { %71 = dma.hbm_to_vmem [thread:$0]  %s614_s5, 512, %s66_s28, [#allocation9], %s469_s1, %s469_s1, %s470_s23  }
  0x54   :  { %459 = dma.done.wait [#allocation3], 128  }
  0x55   :  { %460 = vsyncadd [#allocation3], 4294967168 }
  0x56   :  { %461 = dma.done.wait [#allocation6], 256  }
  0x57   :  { %462 = vsyncadd [#allocation6], 4294967040 }
  0x58   :  { %463 = dma.done.wait [#allocation9], 768  }
  0x59   :  { %464 = vsyncadd [#allocation9], 4294966528  ;;  %v474_v0 = vmov 0.0|0.0   ;;  %vm475_vm0 = vmmov 0   ;;  %v476_v1 = vmov 0.0   ;;  %v97_v2 = vld [vmem:[#allocation10] sm:$0xff] }
  0x5a   :  { %305 = vmatprep.subr.bf16.mxu0 %v474_v0  ;;  %311 = vmatprep.subr.bf16.mxu1 %v474_v0  ;;  %v98_v3 = vld [vmem:[#allocation10 + $0x8] sm:$0xff]  ;;  %v95_v4 = vld [vmem:[#allocation8] sm:$0xff]  ;;  %v96_v6 = vld [vmem:[#allocation8 + $0x8] sm:$0xff]  ;;  %vm175_vm1 = vcmask 130048   ;;  %vm101_vm2 = vcmask 261120  }
  0x5b   :  { %302 = vmatprep.mubr.msk.f32.mxu1 %vm475_vm0, %v476_v1  ;;  %295 = vmatprep.mubr.msk.f32.mxu0 %vm475_vm0, %v476_v1  ;;  %v306_v5 = vpack.c.bf16 %v98_v3, %v97_v2  ;;  %v99_v7 = vld [vmem:[#allocation10 + $0x10] sm:$0xff]  ;;  %v100_v8 = vld [vmem:[#allocation10 + $0x18] sm:$0xff]  ;;  %v312_v9 = vpack.c.bf16 %v96_v6, %v95_v4  ;;  %v90_v11 = vld [vmem:[#allocation5] sm:$0xff] }
  0x5c   :  { %v89_v10 = vld [vmem:[#allocation2] sm:$0xff]  ;;  %v309_v12 = vpack.c.bf16 %v100_v8, %v99_v7  ;;  %v92_v14 = vld [vmem:[#allocation7] sm:$0xff] }
  0x5d   :  { %307 = vmatpush3.bf16.msra.mxu0 %v306_v5  ;;  %v91_v13 = vadd.f32 %v90_v11, %v89_v10  ;;  %v93_v15 = vld [vmem:[%s612_s3] sm:$0xff]  ;;  %313 = vmatpush3.bf16.msra.mxu1 %v312_v9  ;;  %s477_s3 = smov [#allocation11]  }
  0x5e   :  { %308 = vmatprep.subr.bf16.mxu0 %v474_v0  ;;  %v94_v16 = vadd.f32 %v93_v15, %v92_v14  ;;  %v278_v20 = vld [vmem:[%s615_s6] ss:$0 sm:$0xff]  ;;  %s265_s27 = sshll.u32 %s477_s3, 4  ;;  %s266_s27 = int_to_ptr.vmem [resolvable:$true] %s265_s27 }
  0x5f   :  { %s437_s15 = scalar_lea.vmem %s266_s27, 128  ;;  %p442_p13 = scmp.lt.s32.totalorder %s266_s27, %s266_s27 }
  0x60   :  { %303 = vmatmul.mubr.msk.f32.vlgmr.msra.gmra.mrb[0].mxu1 %vm175_vm1, %v91_v13  ;;  %p438_p12 = scmp.ne.s32.totalorder %s266_s27, %s437_s15  ;;  %p443_p0 = scmp.lt.s32.totalorder %s437_s15, %s437_s15 }
  0x61   :  { %310 = vmatpush3.bf16.msra.mxu0 %v309_v12 }
  0x62   :  { %p444_p1 = por %p443_p0, %p442_p13 }
  0x64   :  { %296 = vmatmul.mubr.msk.f32.vlgmr.msra.gmra.mrb[0].mxu0 %vm101_vm2, %v94_v16  ;;  %p445_p2 = pnand %p444_p1, %p438_p12 }
 0x133   :  { %v245_v17 = vpop.f32.mrb[0].mxu1 }
 0x134   :  { %v304_v18 = vpop.f32.mrb[1].mxu1 }
 0x137   :  { %v171_v19 = vpop.f32.mrb[0].mxu0 }
 0x138   :  { %v246_v21 = vadd.f32 %v245_v17, %v171_v19  ;;  %v297_v22 = vpop.f32.mrb[1].mxu0 }
 0x13a   :  { %v256_v23 = vadd.f32 %v278_v20, %v246_v21 }
 0x13c   :  { %325 = vtanh.f32 %v256_v23 }
 0x146   :  { %v326_v24 = vpop.eup %325 }
 0x147   :  { %258 = vst [vmem:[#allocation11] sm:$0xff] %v326_v24 }
 0x148   :  { %448 = shalt.err (!%p445_p2)
}
 0x149   :  { %s449_s6 = scalar_lea.hbm %s616_s7, 128 }
 0x14a   :  { %p450_p3 = scmp.ne.s32.totalorder %s616_s7, %s449_s6  ;;  %p453_p4 = scmp.lt.u32.totalorder %s449_s6, %s616_s7 }
 0x14c   :  { %p455_p5 = pnand %p453_p4, %p450_p3 }
 0x14e   :  { %458 = shalt.err (!%p455_p5)
}
 0x14f   :  { %268 = dma.vmem_to_hbm [thread:$0]  %s266_s27, 128, %s616_s7, [#allocation4]  }
 0x150   :  { %465 = dma.done.wait [#allocation4], 128  }
 0x151   :  { %466 = vsyncadd [#allocation4], 4294967168 }
 0x152   :  { %272 = vsyncpa [#allocation3], 1 }
 0x153   :  { %273 = vsyncpa [#allocation6], 1 }
 0x154   :  { %274 = vsyncpa [#allocation9], 1 }
 0x155   :  { %275 = vsyncpa [#allocation4], 1 }

</bundles_post_ra>
